<compile_context>
chip_gen: v5e
topology: v5e:2x2
jax: 0.10.0
libtpu: 0.0.40
codegen_flags: <defaults>
</compile_context>

<pallas_src>
import functools

import jax
import jax.numpy as jnp
from jax.experimental import pallas as pl
from jax.experimental.pallas import tpu as pltpu

_LANE = 128
_MIB = 1024 * 1024


def _cdiv(a, b):
    return -(-a // b)


def _round_up(x, m):
    return _cdiv(x, m) * m


def _vmem_capacity_bytes():
    """Physical VMEM of the local TPU generation.  Falls back to 64 MiB (the
    smallest current part, v7x) so derived budgets are always safe."""
    try:
        cap = getattr(pltpu.get_tpu_info(), "vmem_capacity_bytes", None)
        if cap:
            return int(cap)
    except Exception:
        pass
    return 64 * _MIB


def _tk_candidates(h_pad):
    cands = [h_pad]
    for t in (8192, 4096, 2048, 1024, 512, 256, 128):
        if t < h_pad and h_pad % t == 0:
            cands.append(t)
    return cands


def _vmem_need_bytes(tb, tk, hs, lp, h_chunk, cdt_size, single_k, n_bt):
    """Conservative VMEM footprint estimate (buffers + in-kernel temporaries)."""
    x_bufs = 1 if (single_k and n_bt == 1) else 2
    w1_bufs = 1 if single_k else 2
    need = (x_bufs * tb * tk * cdt_size              # features tile buffers
            + tb * tk * cdt_size                     # loaded features value
            + w1_bufs * tk * hs * cdt_size           # dense-weight slab buffers
            + hs * 4 + hs * lp * cdt_size + lp * 4   # b1 / w2 / b2 (single-buffered)
            + 2 * tb * lp * 4                        # f32 output tile (double-buffered)
            + tb * lp * 4                            # partial-logit accumulator value
            + tb * h_chunk * (8 + cdt_size))         # chunked epilogue temporaries
    if not single_k:
        need += 2 * tb * hs * 4                      # acc scratch + dot temporary
    return need


def _select_config(batch, h_pad, lp, n_split, cdt_size, vmem_budget,
                   prefer_ktile, force_tk):
    """Pick (tb, n_bt, tk, h_chunk, vmem_need) fitting `vmem_budget`."""
    sublane = 16 if cdt_size < 4 else 8
    hs = h_pad // n_split
    h_chunk = 512 if hs % 512 == 0 else (256 if hs % 256 == 0 else 128)

    if force_tk is not None:
        cands = [force_tk]
    else:
        cands = _tk_candidates(h_pad)
        if prefer_ktile:
            # Want n_k >= 2 (ideally ~4) so the big w1 HBM stream overlaps compute.
            kt = [t for t in cands if t < h_pad and t <= max(h_pad // 4, 512)]
            cands = kt or cands

    # Batch tile: minimise padding (<= 256 rows), shrink only if VMEM-bound.
    tb = _round_up(_cdiv(batch, _cdiv(batch, 256)), sublane)
    while True:
        n_bt = _cdiv(batch, tb)
        for tk in cands:
            single_k = tk == h_pad
            need = _vmem_need_bytes(tb, tk, hs, lp, h_chunk, cdt_size,
                                    single_k, n_bt)
            if force_tk is not None or need <= vmem_budget:
                return tb, n_bt, tk, h_chunk, need
        if tb <= sublane:            # last resort: smallest tiles, proceed anyway
            tk = cands[-1]
            need = _vmem_need_bytes(tb, tk, hs, lp, h_chunk, cdt_size,
                                    tk == h_pad, n_bt)
            return tb, n_bt, tk, h_chunk, need
        tb = max(sublane, _round_up(tb // 2, sublane))


# --------------------------------------------------------------------------- kernels
def _head_kernel_fused(x_ref, w1_ref, b1_ref, w2_ref, b2_ref, o_ref, *, h_chunk):
    """Single-K-step path: dense -> tanh -> out_proj streamed in column chunks.

    No VMEM accumulator; per chunk the dense MXU matmul, the EUP tanh and the
    out_proj MXU matmul pipeline against each other and temporaries stay
    (tb, h_chunk)-sized.
    """
    j = pl.program_id(0)                      # dense-output split index (0 or 1)
    x = x_ref[...]                            # (tb, H_pad) compute dtype
    hs = w1_ref.shape[1]
    # Add the out_proj bias exactly once (split j == 0); partial logits of the
    # splits are summed by the wrapper.
    out = (j == 0).astype(jnp.float32) * b2_ref[...]
    for c0 in range(0, hs, h_chunk):
        c1 = c0 + h_chunk
        acc = jnp.dot(x, w1_ref[:, c0:c1], preferred_element_type=jnp.float32)
        h = jnp.tanh(acc + b1_ref[:, c0:c1])
        out = out + jnp.dot(h.astype(w2_ref.dtype), w2_ref[c0:c1, :],
                            preferred_element_type=jnp.float32)
    o_ref[...] = out.astype(o_ref.dtype)


def _head_kernel_ktiled(x_ref, w1_ref, b1_ref, w2_ref, b2_ref, o_ref, acc_ref, *,
                        h_chunk):
    """K-tiled path (dense contraction split over grid axis 2) with an f32 VMEM
    accumulator and the same chunked tanh/out_proj epilogue."""
    j = pl.program_id(0)
    k = pl.program_id(2)

    @pl.when(k == 0)
    def _init():
        acc_ref[...] = jnp.zeros_like(acc_ref)

    acc_ref[...] += jnp.dot(x_ref[...], w1_ref[...],
                            preferred_element_type=jnp.float32)

    @pl.when(k == pl.num_programs(2) - 1)
    def _finalize():
        hs = acc_ref.shape[1]
        out = (j == 0).astype(jnp.float32) * b2_ref[...]
        for c0 in range(0, hs, h_chunk):
            c1 = c0 + h_chunk
            h = jnp.tanh(acc_ref[:, c0:c1] + b1_ref[:, c0:c1])
            out = out + jnp.dot(h.astype(w2_ref.dtype), w2_ref[c0:c1, :],
                                preferred_element_type=jnp.float32)
        o_ref[...] = out.astype(o_ref.dtype)


# --------------------------------------------------------------------------- wrapper
def prepare_classification_head_params(w_dense, b_dense, w_out, b_out,
                                        compute_dtype=jnp.bfloat16):
    """One-time weight preparation.  Call OUTSIDE the per-step jit and cache.

    Casts matmul operands to the MXU compute dtype, keeps biases in f32, and
    pads to lane-aligned (multiple-of-128) shapes.  Weights are expected in
    (in, out) layout (i.e. already transposed from nn.Linear's (out, in)).
    """
    H, H2 = w_dense.shape
    assert H == H2, "dense layer must be hidden -> hidden"
    L = w_out.shape[1]
    H_pad = _round_up(H, _LANE)
    Lp = _round_up(L, _LANE)
    cdt = jnp.dtype(compute_dtype)
    w1 = jnp.pad(w_dense.astype(cdt), ((0, H_pad - H), (0, H_pad - H)))
    b1 = jnp.pad(jnp.reshape(b_dense, (1, H)).astype(jnp.float32),
                 ((0, 0), (0, H_pad - H)))
    w2 = jnp.pad(w_out.astype(cdt), ((0, H_pad - H), (0, Lp - L)))
    b2 = jnp.pad(jnp.reshape(b_out, (1, L)).astype(jnp.float32),
                 ((0, 0), (0, Lp - L)))
    return dict(w1=w1, b1=b1, w2=w2, b2=b2, hidden_size=H, num_labels=L)


@functools.partial(jax.jit,
                   static_argnames=("hidden_size", "num_labels", "_force_tk"))
def classification_head(features, w1, b1, w2, b2, *, hidden_size, num_labels,
                        _force_tk=None):
    """features: [B, hidden]; weights from prepare_classification_head_params.
    Returns logits [B, num_labels]."""
    B, H = features.shape
    assert H == hidden_size, (H, hidden_size)
    H_pad = w1.shape[0]
    Lp = w2.shape[1]
    cdt = w1.dtype
    cdt_size = jnp.dtype(cdt).itemsize

    # ---- generation-aware VMEM budget ------------------------------------
    vmem_cap = _vmem_capacity_bytes()            # 64 MiB v7x, 128 MiB v5e/v6e
    vmem_budget = int(vmem_cap * 0.8)            # leave compiler headroom

    # ---- tiling -----------------------------------------------------------
    # Split the dense-output dim across 2 grid-parallel slabs when there is a
    # single batch tile: on v7x each TensorCore streams half of w1/w2 (and the
    # partial logits are summed in the wrapper); near-free on 1-TC parts.
    n_bt_hint = _cdiv(B, 256)
    n_split = 2 if (n_bt_hint == 1 and H_pad % 256 == 0) else 1
    Hs = H_pad // n_split
    # For one large batch tile (128 < B <= 256) keep a small K-tiling so the
    # dominant w1 HBM stream overlaps compute instead of being fully exposed
    # ahead of a single grid step.
    prefer_ktile = (B > 128 and n_bt_hint == 1 and H_pad > 128)
    tb, n_bt, tk, h_chunk, vmem_need = _select_config(
        B, H_pad, Lp, n_split, cdt_size, vmem_budget, prefer_ktile, _force_tk)
    single_k = tk == H_pad
    n_k = H_pad // tk
    B_pad = n_bt * tb

    # ---- per-call activation plumbing (weights are already prepared) ------
    x = features.astype(cdt)
    if H_pad != H:
        x = jnp.pad(x, ((0, 0), (0, H_pad - H)))
    if B_pad != B:
        x = jnp.pad(x, ((0, B_pad - B), (0, 0)))

    single_buf = {"pipeline_mode": pl.Buffered(1)}
    in_specs = [
        # features: varies with (i, k); single-buffer when fully grid-invariant.
        pl.BlockSpec((tb, tk), lambda j, i, k: (i, k),
                     **(single_buf if (single_k and n_bt == 1) else {})),
        # dense weight slab: constant across batch tiles (never re-streamed per
        # batch tile when single_k); single-buffer in that case.
        pl.BlockSpec((tk, Hs), lambda j, i, k: (k, j),
                     **(single_buf if single_k else {})),
        pl.BlockSpec((1, Hs), lambda j, i, k: (0, j), **single_buf),
        pl.BlockSpec((Hs, Lp), lambda j, i, k: (j, 0), **single_buf),
        pl.BlockSpec((1, Lp), lambda j, i, k: (0, 0), **single_buf),
    ]
    out_spec = pl.BlockSpec((None, tb, Lp), lambda j, i, k: (j, i, 0))

    if single_k:
        kernel = functools.partial(_head_kernel_fused, h_chunk=h_chunk)
        scratch = []
    else:
        kernel = functools.partial(_head_kernel_ktiled, h_chunk=h_chunk)
        scratch = [pltpu.VMEM((tb, Hs), jnp.float32)]

    vmem_limit = int(min(vmem_budget,
                         max(32 * _MIB, int(vmem_need * 1.5) + 2 * _MIB)))

    partial_logits = pl.pallas_call(
        kernel,
        out_shape=jax.ShapeDtypeStruct((n_split, B_pad, Lp), jnp.float32),
        grid_spec=pltpu.PrefetchScalarGridSpec(
            num_scalar_prefetch=0,
            grid=(n_split, n_bt, n_k),
            in_specs=in_specs,
            out_specs=out_spec,
            scratch_shapes=scratch,
        ),
        compiler_params=pltpu.CompilerParams(
            dimension_semantics=("parallel", "parallel", "arbitrary"),
            vmem_limit_bytes=vmem_limit,
        ),
    )(x, w1, b1, w2, b2)

    logits = partial_logits[0] if n_split == 1 else partial_logits.sum(axis=0)
    return logits[:B, :num_labels].astype(features.dtype)


def apply_classification_head(features, params, _force_tk=None):
    return classification_head(features, params["w1"], params["b1"],
                               params["w2"], params["b2"],
                               hidden_size=params["hidden_size"],
                               num_labels=params["num_labels"],
                               _force_tk=_force_tk)


# --------------------------------------------------------------------------- test
def _init_linear(key, fan_in, fan_out, dtype=jnp.float32):
    """nn.Linear-style uniform(-1/sqrt(fan_in), ...) init; weight as (in, out)."""
    kw, kb = jax.random.split(key)
    bound = float(fan_in) ** -0.5
    w = jax.random.uniform(kw, (fan_in, fan_out), dtype, -bound, bound)
    b = jax.random.uniform(kb, (fan_out,), dtype, -bound, bound)
    return w, b


def _reference(features, w_dense, b_dense, w_out, b_out, compute_dtype=jnp.bfloat16):
    """Mixed-precision reference matching the kernel (bf16 MXU, f32 accumulate)."""
    cdt = compute_dtype
    h = jnp.dot(features.astype(cdt), w_dense.astype(cdt),
                preferred_element_type=jnp.float32) + b_dense
    h = jnp.tanh(h)
    out = jnp.dot(h.astype(cdt), w_out.astype(cdt),
                  preferred_element_type=jnp.float32) + b_out
    return out.astype(features.dtype)


def _check(B, H, L, key, force_tk=None):
    k_x, k_d, k_o = jax.random.split(key, 3)
    features = jax.random.normal(k_x, (B, H), jnp.float32)
    w_dense, b_dense = _init_linear(k_d, H, H)
    w_out, b_out = _init_linear(k_o, H, L)

    params = prepare_classification_head_params(w_dense, b_dense, w_out, b_out)
    logits = apply_classification_head(features, params, _force_tk=force_tk)
    jax.block_until_ready(logits)
    assert logits.shape == (B, L), logits.shape

    ref = _reference(features, w_dense, b_dense, w_out, b_out)
    err = float(jnp.max(jnp.abs(logits - ref)))
    assert jnp.allclose(logits, ref, atol=2e-2, rtol=2e-2), err

    ref_f32 = jnp.tanh(features @ w_dense + b_dense) @ w_out + b_out
    err32 = float(jnp.max(jnp.abs(logits - ref_f32)))
    assert jnp.allclose(logits, ref_f32, atol=5e-2, rtol=5e-2), err32


if __name__ == "__main__":
    key = jax.random.PRNGKey(0)
    k1, k2, k3 = jax.random.split(key, 3)
    # Basic path: single batch tile, H == H_pad == 128, labels lane-padded.
    _check(8, 128, 8, k1)
    # Dense-output split path (n_split == 2) + label padding, fused single-K kernel.
    _check(4, 256, 3, k2)
    # K-tiled accumulator path (forced tk=128 -> 2 K steps) + ragged hidden (192->256).
    _check(6, 192, 5, k3, force_tk=128)
    print("KERNEL_OK")
</pallas_src>

<mosaic_0001>
module attributes {stable_mosaic.version = 11 : i64} {
  func.func @_head_kernel_fused(%arg0: i32, %arg1: i32, %arg2: i32, %arg3: memref<16x128xbf16, #tpu.memory_space<vmem>>, %arg4: memref<128x128xbf16, #tpu.memory_space<vmem>>, %arg5: memref<1x128xf32, #tpu.memory_space<vmem>>, %arg6: memref<128x128xbf16, #tpu.memory_space<vmem>>, %arg7: memref<1x128xf32, #tpu.memory_space<vmem>>, %arg8: memref<1x16x128xf32, #tpu.memory_space<vmem>>) attributes {dimension_semantics = [#tpu.dimension_semantics<parallel>, #tpu.dimension_semantics<parallel>, #tpu.dimension_semantics<arbitrary>], iteration_bounds = array<i64: 1, 1, 1>, scalar_prefetch = 0 : i64, scratch_operands = 0 : i64, tpu.core_type = #tpu.core_type<tc>, window_params = [{pipeline_mode = #tpu.pipeline_mode<synchronous>, transform_indices = @transform_0, window_bounds = array<i64: 16, 128>}, {pipeline_mode = #tpu.pipeline_mode<synchronous>, transform_indices = @transform_1, window_bounds = array<i64: 128, 128>}, {pipeline_mode = #tpu.pipeline_mode<synchronous>, transform_indices = @transform_2, window_bounds = array<i64: 1, 128>}, {pipeline_mode = #tpu.pipeline_mode<synchronous>, transform_indices = @transform_3, window_bounds = array<i64: 128, 128>}, {pipeline_mode = #tpu.pipeline_mode<synchronous>, transform_indices = @transform_4, window_bounds = array<i64: 1, 128>}, {transform_indices = @transform_5, window_bounds = array<i64: 1, 16, 128>}]} {
    %c0 = arith.constant 0 : index
    %c0_0 = arith.constant 0 : index
    %0 = vector.load %arg3[%c0, %c0_0] : memref<16x128xbf16, #tpu.memory_space<vmem>>, vector<16x128xbf16>
    %c0_i32 = arith.constant 0 : i32
    %1 = arith.cmpi eq, %arg0, %c0_i32 : i32
    %2 = arith.extui %1 : i1 to i32
    %3 = arith.sitofp %2 : i32 to f32
    %c0_1 = arith.constant 0 : index
    %c0_2 = arith.constant 0 : index
    %4 = vector.load %arg7[%c0_1, %c0_2] : memref<1x128xf32, #tpu.memory_space<vmem>>, vector<1x128xf32>
    %5 = vector.broadcast %3 : f32 to vector<1x128xf32>
    %6 = arith.mulf %5, %4 : vector<1x128xf32>
    %c0_3 = arith.constant 0 : index
    %c0_4 = arith.constant 0 : index
    %7 = vector.load %arg4[%c0_3, %c0_4] : memref<128x128xbf16, #tpu.memory_space<vmem>>, vector<128x128xbf16>
    %cst = arith.constant dense<0.000000e+00> : vector<16x128xf32>
    %8 = tpu.matmul %0, %7, %cst {dimension_numbers = #tpu.dot_dimension_numbers<[1], [0], [0], [1], [0, 0, 1, 1], [], []>} : vector<16x128xbf16>, vector<128x128xbf16>, vector<16x128xf32> -> vector<16x128xf32>
    %c0_5 = arith.constant 0 : index
    %c0_6 = arith.constant 0 : index
    %9 = vector.load %arg5[%c0_5, %c0_6] : memref<1x128xf32, #tpu.memory_space<vmem>>, vector<1x128xf32>
    %10 = vector.broadcast %9 : vector<1x128xf32> to vector<16x128xf32>
    %11 = arith.addf %8, %10 : vector<16x128xf32>
    %12 = math.tanh %11 : vector<16x128xf32>
    %13 = arith.truncf %12 : vector<16x128xf32> to vector<16x128xbf16>
    %c0_7 = arith.constant 0 : index
    %c0_8 = arith.constant 0 : index
    %14 = vector.load %arg6[%c0_7, %c0_8] : memref<128x128xbf16, #tpu.memory_space<vmem>>, vector<128x128xbf16>
    %cst_9 = arith.constant dense<0.000000e+00> : vector<16x128xf32>
    %15 = tpu.matmul %13, %14, %cst_9 {dimension_numbers = #tpu.dot_dimension_numbers<[1], [0], [0], [1], [0, 0, 1, 1], [], []>} : vector<16x128xbf16>, vector<128x128xbf16>, vector<16x128xf32> -> vector<16x128xf32>
    %16 = vector.broadcast %6 : vector<1x128xf32> to vector<16x128xf32>
    %17 = arith.addf %16, %15 : vector<16x128xf32>
    %c0_10 = arith.constant 0 : index
    %c0_11 = arith.constant 0 : index
    %c0_12 = arith.constant 0 : index
    %18 = vector.load %arg8[%c0_10, %c0_11, %c0_12] : memref<1x16x128xf32, #tpu.memory_space<vmem>>, vector<1x16x128xf32>
    %19 = vector.shape_cast %18 : vector<1x16x128xf32> to vector<16x128xf32>
    %20 = vector.shape_cast %17 : vector<16x128xf32> to vector<1x16x128xf32>
    tpu.vector_store %arg8[%c0_10, %c0_11, %c0_12], %20 {strides = array<i32>} : memref<1x16x128xf32, #tpu.memory_space<vmem>>, vector<1x16x128xf32>,
    return
  }
  func.func @transform_0(%arg0: i32, %arg1: i32, %arg2: i32) -> (i32, i32) {
    %c0_i32 = arith.constant 0 : i32
    return %arg1, %arg2 : i32, i32
  }
  func.func @transform_1(%arg0: i32, %arg1: i32, %arg2: i32) -> (i32, i32) {
    %c0_i32 = arith.constant 0 : i32
    return %arg2, %arg0 : i32, i32
  }
  func.func @transform_2(%arg0: i32, %arg1: i32, %arg2: i32) -> (i32, i32) {
    %c0_i32 = arith.constant 0 : i32
    %c0_i32_0 = arith.constant 0 : i32
    return %c0_i32, %arg0 : i32, i32
  }
  func.func @transform_3(%arg0: i32, %arg1: i32, %arg2: i32) -> (i32, i32) {
    %c0_i32 = arith.constant 0 : i32
    %c0_i32_0 = arith.constant 0 : i32
    return %arg0, %c0_i32 : i32, i32
  }
  func.func @transform_4(%arg0: i32, %arg1: i32, %arg2: i32) -> (i32, i32) {
    %c0_i32 = arith.constant 0 : i32
    %c0_i32_0 = arith.constant 0 : i32
    %c0_i32_1 = arith.constant 0 : i32
    return %c0_i32, %c0_i32_0 : i32, i32
  }
  func.func @transform_5(%arg0: i32, %arg1: i32, %arg2: i32) -> (i32, i32, i32) {
    %c0_i32 = arith.constant 0 : i32
    %c0_i32_0 = arith.constant 0 : i32
    return %arg0, %arg1, %c0_i32 : i32, i32, i32
  }
}

</mosaic_0001>

<bundles_post_ra>
// kernel: classification_head.1
= control target key start
LH: loop header
LB: loop body
LE: loop exit
PB: predicated region body
PF: predicated region fallthrough
CT: control target
= control target key end

     0   :  { %10 = vsyncpa [#allocation3], 0  ;;  %s444_s0 = inlined_call_operand.vmem [shape: bf16[16,128], index: 0, kind: input, shape index: {}]   ;;  %s445_s1 = inlined_call_operand.hbm [shape: bf16[128,128], index: 1, kind: input, shape index: {}]   ;;  %s446_s2 = inlined_call_operand.vmem [shape: f32[1,128], index: 2, kind: input, shape index: {}]   ;;  %s447_s3 = inlined_call_operand.hbm [shape: bf16[128,128], index: 3, kind: input, shape index: {}]   ;;  %s448_s4 = inlined_call_operand.vmem [shape: f32[1,128], index: 4, kind: input, shape index: {}]   ;;  %s449_s5 = inlined_call_operand.vmem [shape: f32[1,16,128], index: 5, kind: output, shape index: {}]  }
   0x1   :  { %s18_s20 = sshll.u32 %s445_s1, 4  ;;  %s19_s20 = int_to_ptr.hbm [resolvable:$true] %s18_s20 }
   0x2   :  { %11 = vsyncpa [#allocation5], 0  ;;  %s389_s21 = smov [#allocation2]   ;;  %s33_s25 = sshll.u32 %s447_s3, 4  ;;  %s34_s25 = int_to_ptr.hbm [resolvable:$true] %s33_s25 }
   0x3   :  { %s20_s22 = sshll.u32 %s389_s21, 4  ;;  %s390_s26 = smov 64   ;;  %s21_s22 = int_to_ptr.vmem [resolvable:$true] %s20_s22 }
   0x4   :  { %s391_s27 = smov 4   ;;  %s392_s28 = smov [#allocation4]  }
   0x5   :  { %26 = dma.hbm_to_vmem [thread:$0]  %s19_s20, 1024, %s21_s22, [#allocation3], %s390_s26, %s390_s26, %s391_s27  }
   0x6   :  { %s35_s29 = sshll.u32 %s392_s28, 4  ;;  %s36_s29 = int_to_ptr.vmem [resolvable:$true] %s35_s29 }
   0x7   :  { %41 = dma.hbm_to_vmem [thread:$0]  %s34_s25, 1024, %s36_s29, [#allocation5], %s390_s26, %s390_s26, %s391_s27  }
   0x8   :  { %385 = dma.done.wait [#allocation3], 1024  }
   0x9   :  { %386 = vsyncadd [#allocation3], 4294966272 }
   0xa   :  { %387 = dma.done.wait [#allocation5], 1024  }
   0xb   :  { %388 = vsyncadd [#allocation5], 4294966272  ;;  %v318_v0 = vld [vmem:[#allocation2 + $0x38] sm:$0xff]  ;;  %v317_v1 = vld [vmem:[#allocation2 + $0x30] sm:$0xff] }
   0xc   :  { %134 = vmatpush.bf16.msra.mxu0 %v318_v0  ;;  %v326_v2 = vld [vmem:[#allocation4 + $0x38] sm:$0xff]  ;;  %v325_v3 = vld [vmem:[#allocation4 + $0x30] sm:$0xff]  ;;  %v316_v4 = vld [vmem:[#allocation2 + $0x28] sm:$0xff] }
   0xd   :  { %215 = vmatpush.bf16.msra.mxu1 %v326_v2  ;;  %v324_v5 = vld [vmem:[#allocation4 + $0x28] sm:$0xff]  ;;  %v315_v6 = vld [vmem:[#allocation2 + $0x20] sm:$0xff]  ;;  %v314_v7 = vld [vmem:[#allocation2 + $0x18] sm:$0xff] }
   0xe   :  { %v313_v8 = vld [vmem:[#allocation2 + $0x10] sm:$0xff]  ;;  %v312_v9 = vld [vmem:[#allocation2 + $0x8] sm:$0xff]  ;;  %v311_v10 = vld [vmem:[#allocation2] sm:$0xff] }
   0xf   :  { %v310_v11 = vld [vmem:[%s444_s0] sm:$0xff]  ;;  %v322_v13 = vld [vmem:[#allocation4 + $0x18] sm:$0xff]  ;;  %v321_v14 = vld [vmem:[#allocation4 + $0x10] sm:$0xff] }
  0x10   :  { %135 = vmatpush.bf16.msra.mxu0 %v317_v1  ;;  %v323_v12 = vld [vmem:[#allocation4 + $0x20] sm:$0xff]  ;;  %v320_v15 = vld [vmem:[#allocation4 + $0x8] sm:$0xff] }
  0x11   :  { %216 = vmatpush.bf16.msra.mxu1 %v325_v3  ;;  %v319_v16 = vld [vmem:[#allocation4] sm:$0xff] }
  0x12   :  { %v331_v18 = vld [vmem:[%s446_s2] ss:$0 sm:$0xff] }
  0x13   :  { %v332_v25 = vld [vmem:[%s448_s4] ss:$0 sm:$0xff] }
  0x14   :  { %136 = vmatpush.bf16.msra.mxu0 %v316_v4 }
  0x15   :  { %217 = vmatpush.bf16.msra.mxu1 %v324_v5 }
  0x18   :  { %137 = vmatpush.bf16.msra.mxu0 %v315_v6 }
  0x19   :  { %218 = vmatpush.bf16.msra.mxu1 %v323_v12 }
  0x1c   :  { %138 = vmatpush.bf16.msra.mxu0 %v314_v7 }
  0x1d   :  { %219 = vmatpush.bf16.msra.mxu1 %v322_v13 }
  0x20   :  { %139 = vmatpush.bf16.msra.mxu0 %v313_v8 }
  0x21   :  { %220 = vmatpush.bf16.msra.mxu1 %v321_v14 }
  0x24   :  { %140 = vmatpush.bf16.msra.mxu0 %v312_v9 }
  0x25   :  { %221 = vmatpush.bf16.msra.mxu1 %v320_v15 }
  0x28   :  { %141 = vmatpush.bf16.msra.mxu0 %v311_v10 }
  0x29   :  { %222 = vmatpush.bf16.msra.mxu1 %v319_v16 }
  0x2b   :  { %142 = vmatmul.bf16.vlgmr.msra.gmra.mxu0 %v310_v11 }
  0xa8   :  { %v143_v17 = vpop.f32.mrf.mxu0 }
  0xa9   :  { %v144_v19 = vadd.f32 %v331_v18, %v143_v17 }
  0xab   :  { %333 = vtanh.f32 %v144_v19 }
  0xb0   :  { %v145_v20 = vpop.f32.mrf.mxu0 }
  0xb1   :  { %v146_v21 = vadd.f32 %v331_v18, %v145_v20  ;;  %v334_v22 = vpop.eup %333 }
  0xb3   :  { %335 = vtanh.f32 %v146_v21 }
  0xb9   :  { %v336_v23 = vpop.eup %335 }
  0xba   :  { %v150_v24 = vpack.c.bf16 %v336_v23, %v334_v22 }
  0xbc   :  { %223 = vmatmul.bf16.vlgmr.msra.gmra.mxu1 %v150_v24 }
 0x139   :  { %v224_v26 = vpop.f32.mrf.mxu1 }
 0x13a   :  { %v232_v27 = vadd.f32 %v332_v25, %v224_v26 }
 0x13c   :  { %234 = vst [vmem:[%s449_s5] sm:$0xff] %v232_v27 }
 0x141   :  { %v226_v28 = vpop.f32.mrf.mxu1 }
 0x142   :  { %v233_v29 = vadd.f32 %v332_v25, %v226_v28 }
 0x144   :  { %235 = vst [vmem:[%s449_s5 + $0x8] sm:$0xff] %v233_v29 }
 0x145   :  { %240 = vsyncpa [#allocation3], 1 }
 0x146   :  { %241 = vsyncpa [#allocation5], 1 }

</bundles_post_ra>
